<compile_context>
chip_gen: v6e
topology: v6e:2x2x1
jax: 0.10.0
libtpu: 0.0.40
codegen_flags: <defaults>
</compile_context>

<pallas_src>
import functools

import jax
import jax.numpy as jnp
from jax.experimental import pallas as pl
from jax.experimental.pallas import tpu as pltpu

LANE = 128


def _cdiv(a: int, b: int) -> int:
    return -(-a // b)


def _round_up(a: int, b: int) -> int:
    return _cdiv(a, b) * b


def _vmem_budget_bytes() -> int:
    """Generation-aware pipeline budget: ~70% of per-core VMEM, capped at 64 MiB
    (v5e/v6e have 128 MiB per TensorCore, v7x has 64 MiB)."""
    try:
        cap = int(pltpu.get_tpu_info().vmem_capacity_bytes)
    except Exception:  # fallback (e.g. interpret mode)
        cap = 64 << 20
    return int(min(64 << 20, int(cap * 0.7)))


def _rms_dyad_relu_kernel(x_ref, w_ref, *rest, eps, has_bias):
    if has_bias:
        b_ref, out_ref = rest
    else:
        (out_ref,) = rest

    # Per-sample RMS over the full feature axis (one scalar per batch column).
    x = x_ref[...].astype(jnp.float32)                    # (F, TB)
    ms = jnp.mean(x * x, axis=0, keepdims=True)           # (1, TB)
    fc = jax.lax.rsqrt(ms + eps)                          # 1 / rms
    xn = (x * fc).astype(w_ref.dtype)                     # bf16 MXU operand

    # One fused MXU matmul; dyad block-diag + block-anti-diag structure and the
    # rms_params column gains are already folded into w_ref.  Single bf16 pass with
    # f32 accumulation (no Precision.HIGHEST multi-pass emulation).
    y = jnp.dot(w_ref[...], xn, preferred_element_type=jnp.float32)
    if has_bias:
        y = y + b_ref[...]                                # f32 bias, broadcast over lanes
    out_ref[...] = jnp.maximum(y, 0.0).astype(out_ref.dtype)


def prepare_rms_dyad_relu_params(rms_params, w_upper, w_lower, bias=None,
                                 *, weight_dtype=jnp.bfloat16):
    """Fold the dyad structure + rms gains into one dense weight.  Call ONCE per set of
    parameters and reuse the result across forward calls (hoisted out of the hot path)."""
    dy, do, di = w_upper.shape
    eye = jnp.eye(dy, dtype=jnp.float32)
    # block-diagonal (upper) and block-anti-diagonal (lower) placement, no scatter chain.
    wu = jnp.einsum('gh,goi->gohi', eye, w_upper.astype(jnp.float32))
    wl = jnp.einsum('gh,goi->gohi', eye[::-1], w_lower.astype(jnp.float32))
    wd = (wu + wl).reshape(dy * do, dy * di)
    wd = wd * rms_params.astype(jnp.float32)[None, :]     # fold rms gain into columns
    # TODO(synk): for large dyad_dim this dense fold is (1 - 2/dy) zeros; switch to a
    #             packed (dy, do, 2*di) weight + grouped dot to avoid O(dy^2) work.
    w_fused = wd.astype(weight_dtype)
    bias_col = None if bias is None else bias.astype(jnp.float32).reshape(dy * do, 1)
    return w_fused, bias_col


def rms_dyad_relu_fused(x, w_fused, bias=None, *, eps=1e-6):
    """x: (dy*di, B) -> (dy*do, B) using a pre-folded weight from prepare_...()."""
    F, B = x.shape
    Fo, F2 = w_fused.shape
    assert F == F2, (F, F2)
    has_bias = bias is not None

    dtype = x.dtype
    x_item = jnp.dtype(dtype).itemsize
    w_item = jnp.dtype(w_fused.dtype).itemsize
    per_col = (F + Fo) * x_item                       # streamed x + out bytes per column
    weight_bytes = 2 * Fo * F * w_item + (2 * Fo * 4 if has_bias else 0)

    budget = _vmem_budget_bytes()
    avail = max(budget - weight_bytes - (2 << 20), 2 * LANE * per_col)
    tb_vmem = max(LANE, (avail // (2 * per_col)) // LANE * LANE)      # double-buffered
    tb_target = max(LANE, _round_up(_cdiv(4 << 20, per_col), LANE))   # >= ~4 MiB / step
    tb0 = min(tb_target, tb_vmem)

    if B < LANE:
        tb = B                                        # single full-extent batch block
    else:
        n = _cdiv(B, tb0)
        if B >= 2 * LANE and B * per_col >= (1 << 20):
            n = max(n, 2)                             # keep >=2 steps for v7x megacore
        tb = _round_up(_cdiv(B, n), LANE)             # balanced, lane-dense tiles
        tb = max(LANE, min(tb, tb0, (B // LANE) * LANE))
    grid = (_cdiv(B, tb),)                            # final tile masked if B % tb != 0

    in_specs = [
        pl.BlockSpec((F, tb), lambda i: (0, i)),      # streamed batch tiles
        pl.BlockSpec((Fo, F), lambda i: (0, 0)),      # VMEM-resident fused weight (bf16)
    ]
    args = [x, w_fused]
    if has_bias:
        in_specs.append(pl.BlockSpec((Fo, 1), lambda i: (0, 0)))
        args.append(bias)

    needed = 2 * tb * per_col + weight_bytes + (2 << 20)
    vmem_limit = int(min(max(needed, 16 << 20), budget))

    return pl.pallas_call(
        functools.partial(_rms_dyad_relu_kernel, eps=eps, has_bias=has_bias),
        out_shape=jax.ShapeDtypeStruct((Fo, B), dtype),
        grid=grid,
        in_specs=in_specs,
        out_specs=pl.BlockSpec((Fo, tb), lambda i: (0, i)),
        compiler_params=pltpu.CompilerParams(
            dimension_semantics=("parallel",),
            vmem_limit_bytes=vmem_limit,
        ),
    )(*args)


def rms_dyad_relu(x, rms_params, w_upper, w_lower, bias=None, *, eps=1e-6,
                  weight_dtype=jnp.bfloat16):
    """Convenience wrapper.  For repeated forwards, call prepare_...() once and reuse."""
    w_fused, bias_col = prepare_rms_dyad_relu_params(
        rms_params, w_upper, w_lower, bias, weight_dtype=weight_dtype)
    return rms_dyad_relu_fused(x, w_fused, bias_col, eps=eps)


# ----------------------------- references (pure JAX) -----------------------------

def rms_dyad_relu_reference(x, rms_params, w_upper, w_lower, bias=None, *, eps=1e-6):
    """Unfused full-f32 reference of the reconstructed semantics."""
    dy, do, di = w_upper.shape
    F, B = x.shape
    xf = x.astype(jnp.float32)
    fc = jax.lax.rsqrt(jnp.mean(xf * xf, axis=0, keepdims=True) + eps)
    xn = xf * fc * rms_params.astype(jnp.float32)[:, None]
    xg = xn.reshape(dy, di, B)
    upper = jnp.einsum('goi,gib->gob', w_upper.astype(jnp.float32), xg,
                       precision='highest')
    lower = jnp.einsum('goi,gib->gob', w_lower.astype(jnp.float32), xg[::-1],
                       precision='highest')
    y = (upper + lower).reshape(dy * do, B)
    if bias is not None:
        y = y + bias.astype(jnp.float32)[:, None]
    return jnp.maximum(y, 0.0)


def rms_dyad_relu_fused_reference(x, w_fused, bias=None, *, eps=1e-6):
    """Reference that applies the SAME bf16 operand rounding as the kernel's MXU pass."""
    xf = x.astype(jnp.float32)
    fc = jax.lax.rsqrt(jnp.mean(xf * xf, axis=0, keepdims=True) + eps)
    xn = (xf * fc).astype(w_fused.dtype).astype(jnp.float32)
    y = jnp.dot(w_fused.astype(jnp.float32), xn, precision='highest')
    if bias is not None:
        y = y + bias
    return jnp.maximum(y, 0.0)


if __name__ == "__main__":
    # Module hyper-params (matching RMSDyadReLUBlock.__init__).
    dyad_dim, dim_in, dim_out = 4, 8, 8
    rms_norm_chunk_size = 8   # impl detail of the opaque C++ block; full-feature RMS here
    bs = 16

    key = jax.random.PRNGKey(0)
    kx, ku, kl, kb, kr, kx2, kx3 = jax.random.split(key, 7)

    k = (dyad_dim * dim_in) ** -0.5
    rms_params = 1.0 + 0.1 * jax.random.normal(kr, (dyad_dim * dim_in,), jnp.float32)
    w_upper = jax.random.uniform(ku, (dyad_dim, dim_out, dim_in), jnp.float32,
                                 minval=-k, maxval=k)
    w_lower = jax.random.uniform(kl, (dyad_dim, dim_out, dim_in), jnp.float32,
                                 minval=-k, maxval=k)
    bias = jax.random.uniform(kb, (dyad_dim * dim_out,), jnp.float32,
                              minval=-k, maxval=k)

    # Fold parameters ONCE (hoisted out of the per-call hot path) and reuse.
    w_fused_nb, _ = prepare_rms_dyad_relu_params(rms_params, w_upper, w_lower, None)
    w_fused_b, bias_col = prepare_rms_dyad_relu_params(rms_params, w_upper, w_lower, bias)

    def check(out, x_in, w_fused, b_col, has_bias):
        assert bool(jnp.all(jnp.isfinite(out)))
        # Tight check: identical bf16 operand rounding to the kernel's single MXU pass.
        ref_q = rms_dyad_relu_fused_reference(x_in, w_fused, b_col)
        assert bool(jnp.allclose(out, ref_q, atol=5e-3, rtol=5e-3))
        # Semantic check vs. the full-f32 unfused reference (bf16-matmul tolerance).
        ref_f = rms_dyad_relu_reference(x_in, rms_params, w_upper, w_lower,
                                        bias if has_bias else None)
        assert bool(jnp.allclose(out, ref_f, atol=3e-2, rtol=3e-2))

    # 1) no-bias path (module default has_bias=False), via the convenience wrapper.
    x = jax.random.normal(kx, (dyad_dim * dim_in, bs), jnp.float32)
    out = jax.block_until_ready(rms_dyad_relu(x, rms_params, w_upper, w_lower, None))
    assert out.shape == (dyad_dim * dim_out, bs)
    check(out, x, w_fused_nb, None, False)

    # 2) bias path, pre-folded params.
    out_b = jax.block_until_ready(rms_dyad_relu_fused(x, w_fused_b, bias_col))
    check(out_b, x, w_fused_b, bias_col, True)

    # 3) batch not a multiple of 128 -> multi-step grid with a masked final tile,
    #    no wrapper-side pad/slice.
    x2 = jax.random.normal(kx2, (dyad_dim * dim_in, 700), jnp.float32)
    out2 = jax.block_until_ready(rms_dyad_relu_fused(x2, w_fused_b, bias_col))
    assert out2.shape == (dyad_dim * dim_out, 700)
    check(out2, x2, w_fused_b, bias_col, True)

    # 4) larger batch -> exercises the >=2-step (v7x megacore) balanced-tile split.
    x3 = jax.random.normal(kx3, (dyad_dim * dim_in, 6000), jnp.float32)
    out3 = jax.block_until_ready(rms_dyad_relu_fused(x3, w_fused_nb, None))
    assert out3.shape == (dyad_dim * dim_out, 6000)
    check(out3, x3, w_fused_nb, None, False)

    print("KERNEL_OK")
</pallas_src>

<mosaic_0001>
module attributes {stable_mosaic.version = 11 : i64} {
  func.func @_rms_dyad_relu_kernel(%arg0: i32, %arg1: memref<32x16xf32, #tpu.memory_space<vmem>>, %arg2: memref<32x32xbf16, #tpu.memory_space<vmem>>, %arg3: memref<32x16xf32, #tpu.memory_space<vmem>>) attributes {dimension_semantics = [#tpu.dimension_semantics<parallel>], iteration_bounds = array<i64: 1>, scalar_prefetch = 0 : i64, scratch_operands = 0 : i64, tpu.core_type = #tpu.core_type<tc>, window_params = [{transform_indices = @transform_0, window_bounds = array<i64: 32, 16>}, {pipeline_mode = #tpu.pipeline_mode<synchronous>, transform_indices = @transform_1, window_bounds = array<i64: 32, 32>}, {transform_indices = @transform_2, window_bounds = array<i64: 32, 16>}]} {
    %c0 = arith.constant 0 : index
    %c0_0 = arith.constant 0 : index
    %0 = vector.load %arg1[%c0, %c0_0] : memref<32x16xf32, #tpu.memory_space<vmem>>, vector<32x16xf32>
    %1 = arith.mulf %0, %0 : vector<32x16xf32>
    %cst = arith.constant dense<0.000000e+00> : vector<16xf32>
    %2 = vector.multi_reduction <add>, %1, %cst [0] : vector<32x16xf32> to vector<16xf32>
    %3 = vector.shape_cast %2 : vector<16xf32> to vector<1x16xf32>
    %cst_1 = arith.constant 3.200000e+01 : f32
    %4 = vector.broadcast %cst_1 : f32 to vector<1x16xf32>
    %5 = arith.divf %3, %4 : vector<1x16xf32>
    %cst_2 = arith.constant 9.99999997E-7 : f32
    %6 = vector.broadcast %cst_2 : f32 to vector<1x16xf32>
    %7 = arith.addf %5, %6 : vector<1x16xf32>
    %8 = math.rsqrt %7 : vector<1x16xf32>
    %9 = vector.broadcast %8 : vector<1x16xf32> to vector<32x16xf32>
    %10 = arith.mulf %0, %9 : vector<32x16xf32>
    %11 = arith.truncf %10 : vector<32x16xf32> to vector<32x16xbf16>
    %c0_3 = arith.constant 0 : index
    %c0_4 = arith.constant 0 : index
    %12 = vector.load %arg2[%c0_3, %c0_4] : memref<32x32xbf16, #tpu.memory_space<vmem>>, vector<32x32xbf16>
    %cst_5 = arith.constant dense<0.000000e+00> : vector<32x16xf32>
    %13 = tpu.matmul %12, %11, %cst_5 {dimension_numbers = #tpu.dot_dimension_numbers<[1], [0], [0], [1], [0, 0, 1, 1], [], []>} : vector<32x32xbf16>, vector<32x16xbf16>, vector<32x16xf32> -> vector<32x16xf32>
    %cst_6 = arith.constant 0.000000e+00 : f32
    %14 = vector.broadcast %cst_6 : f32 to vector<32x16xf32>
    %15 = arith.maximumf %13, %14 : vector<32x16xf32>
    %c0_7 = arith.constant 0 : index
    %c0_8 = arith.constant 0 : index
    %16 = vector.load %arg3[%c0_7, %c0_8] : memref<32x16xf32, #tpu.memory_space<vmem>>, vector<32x16xf32>
    tpu.vector_store %arg3[%c0_7, %c0_8], %15 {strides = array<i32>} : memref<32x16xf32, #tpu.memory_space<vmem>>, vector<32x16xf32>,
    return
  }
  func.func @transform_0(%arg0: i32) -> (i32, i32) {
    %c0_i32 = arith.constant 0 : i32
    %c0_i32_0 = arith.constant 0 : i32
    return %c0_i32, %arg0 : i32, i32
  }
  func.func @transform_1(%arg0: i32) -> (i32, i32) {
    %c0_i32 = arith.constant 0 : i32
    %c0_i32_0 = arith.constant 0 : i32
    %c0_i32_1 = arith.constant 0 : i32
    return %c0_i32, %c0_i32_0 : i32, i32
  }
  func.func @transform_2(%arg0: i32) -> (i32, i32) {
    %c0_i32 = arith.constant 0 : i32
    %c0_i32_0 = arith.constant 0 : i32
    return %c0_i32, %arg0 : i32, i32
  }
}

</mosaic_0001>

<bundles_post_ra>
// kernel: tpu_custom_call.1
= control target key start
LH: loop header
LB: loop body
LE: loop exit
PB: predicated region body
PF: predicated region fallthrough
CT: control target
= control target key end

     0   :  { %vm20_vm0 = vcmask 130048   ;;  %vm58_vm1 = vcmask 261120   ;;  %s201_s0 = inlined_call_operand.vmem [shape: f32[32,16], index: 0, kind: input, shape index: {}]   ;;  %s202_s1 = inlined_call_operand.vmem [shape: bf16[32,32], index: 1, kind: input, shape index: {}]   ;;  %s203_s2 = inlined_call_operand.vmem [shape: f32[32,16], index: 2, kind: output, shape index: {}]  }
   0x1   :  { %v12_v0 = vld [vmem:[%s201_s0] sm:$0xff]  ;;  %v13_v1 = vld [vmem:[%s201_s0 + $0x8] sm:$0xff]  ;;  %v14_v2 = vld [vmem:[%s201_s0 + $0x10] sm:$0xff] }
   0x2   :  { %v15_v3 = vld [vmem:[%s201_s0 + $0x18] sm:$0xff]  ;;  %v16_v4 = vmul.f32 %v12_v0, %v12_v0  ;;  %v17_v5 = vmul.f32 %v13_v1, %v13_v1  ;;  %v18_v6 = vmul.f32 %v14_v2, %v14_v2  ;;  %v142_v8 = vld [vmem:[%s202_s1] sm:$0xff]   ;;  %v143_v31 = vld [vmem:[%s202_s1 + $0x8] sm:$0xff]  }
   0x3   :  { %v19_v7 = vmul.f32 %v15_v3, %v15_v3  ;;  %138 = vmatprep.mubr.msk.bf16.mxu0 %vm58_vm1, %v142_v8 }
   0x4   :  { %v21_v9 = vsel %vm20_vm0, %v16_v4, 0.0  ;;  %v22_v10 = vsel %vm20_vm0, %v17_v5, 0.0  ;;  %v24_v11 = vsel %vm20_vm0, %v18_v6, 0.0 }
   0x5   :  { %v23_v12 = vadd.f32 %v22_v10, %v21_v9  ;;  %v26_v13 = vsel %vm20_vm0, %v19_v7, 0.0 }
   0x7   :  { %v25_v14 = vadd.f32 %v24_v11, %v23_v12 }
   0x9   :  { %v27_v15 = vadd.f32 %v26_v13, %v25_v14 }
   0xb   :  { %v28_v16 = vrot.slane %v27_v15, 4 }
   0xd   :  { %v29_v17 = vadd.f32 %v28_v16, %v27_v15 }
   0xf   :  { %v30_v18 = vrot.slane %v29_v17, 2 }
  0x11   :  { %v31_v19 = vadd.f32 %v30_v18, %v29_v17 }
  0x13   :  { %v32_v20 = vrot.slane %v31_v19, 1 }
  0x15   :  { %v33_v21 = vadd.f32 %v32_v20, %v31_v19 }
  0x17   :  { %v35_v22 = vmul.f32 0.03125, %v33_v21 }
  0x19   :  { %v36_v23 = vadd.f32 1e-06, %v35_v22 }
  0x1b   :  { %144 = vrsqrt.f32 %v36_v23 }
  0x28   :  { %v145_v24 = vpop.eup %144 }
  0x29   :  { %v40_v25 = vmul.f32 %v145_v24, %v14_v2  ;;  %v41_v26 = vmul.f32 %v145_v24, %v15_v3  ;;  %v38_v27 = vmul.f32 %v145_v24, %v12_v0  ;;  %v39_v28 = vmul.f32 %v145_v24, %v13_v1 }
  0x2b   :  { %v43_v29 = vpack.c.bf16 %v41_v26, %v40_v25  ;;  %v42_v30 = vpack.c.bf16 %v39_v28, %v38_v27 }
  0x2d   :  { %134 = vmatprep.subr.bf16.mxu0 %v43_v29 }
  0x2e   :  { %135 = vmatpush3.bf16.msra.mxu0 %v43_v29 }
  0x2f   :  { %136 = vmatprep.subr.bf16.mxu0 %v42_v30 }
  0x32   :  { %137 = vmatpush3.bf16.msra.mxu0 %v42_v30 }
  0x35   :  { %139 = vmatmul.mubr.msk.bf16.vlgmr.msra.gmra.mxu0 %vm58_vm1, %v143_v31 }
  0xf5   :  { %v140_v32 = vpop.f32.mrf.mxu0 }
  0xf6   :  { %v116_v33 = vmax.f32 %v140_v32, 0.0 }
  0xf7   :  { %v99_v34 = vpop.f32.mrf.mxu0 }
  0xf8   :  { %120 = vst.msk [vmem:[%s203_s2 + $0x10] sm:$0xff] %vm20_vm0, %v116_v33  ;;  %v114_v35 = vmax.f32 %v99_v34, 0.0 }
  0xf9   :  { %v141_v36 = vpop.f32.mrf.mxu0 }
  0xfa   :  { %118 = vst.msk [vmem:[%s203_s2] sm:$0xff] %vm20_vm0, %v114_v35  ;;  %v117_v37 = vmax.f32 %v141_v36, 0.0 }
  0xfb   :  { %v102_v38 = vpop.f32.mrf.mxu0 }
  0xfc   :  { %121 = vst.msk [vmem:[%s203_s2 + $0x18] sm:$0xff] %vm20_vm0, %v117_v37  ;;  %v115_v39 = vmax.f32 %v102_v38, 0.0 }
  0xfe   :  { %119 = vst.msk [vmem:[%s203_s2 + $0x8] sm:$0xff] %vm20_vm0, %v115_v39 }

</bundles_post_ra>
